<compile_context>
chip_gen: v7x
topology: tpu7x:2x2x1
jax: 0.10.0
libtpu: 0.0.40
codegen_flags: <defaults>
</compile_context>

<pallas_src>
import jax
import jax.numpy as jnp
from jax import lax
from jax.experimental import pallas as pl
from jax.experimental.pallas import tpu as pltpu

INPUT_SIZE = 1
HIDDEN_SIZE = 5


def _rnn_kernel(xT_ref, params_ref, out_ref):
    """Elman RNN, (H, B) state layout.

    h_t[i, b] = tanh( x[b,t]*W_ih[i,0] + (b_ih+b_hh)[i]
                      + sum_j W_hh[i,j] * h_{t-1}[j, b] )

    xT_ref:     (T, B)    input, time-major, size-1 feature dim squeezed (VMEM)
    params_ref: (H, H+2)  [:, :H] = W_hh, [:, H] = W_ih[:, 0], [:, H+1] = b_ih+b_hh
    out_ref:    (T, H, B) hidden state per timestep (state layout)
    """
    T, B = xT_ref.shape
    H = params_ref.shape[0]

    params = params_ref[...]       # (H, H+2)
    xT = xT_ref[...]               # (T, B)

    # Loop-invariant lane broadcasts, hoisted ONCE (JAX does not CSE these).
    w_cols = [jnp.broadcast_to(params[:, j:j + 1], (H, B)) for j in range(H)]
    w_ih_b = jnp.broadcast_to(params[:, H:H + 1], (H, B))
    bias_b = jnp.broadcast_to(params[:, H + 1:H + 2], (H, B))

    # Input projection + bias for ALL timesteps (independent of h, so it sits
    # off the serial critical path): pre[t][i, b] = x[b, t]*W_ih[i,0] + bias[i]
    pre = [w_ih_b * xT[t:t + 1, :] + bias_b for t in range(T)]

    # Fully unrolled recurrence; state lives in vregs.
    # h_0 = 0 (PyTorch default) => first step is just tanh(pre[0]).
    h = jnp.tanh(pre[0])
    out_ref[0] = h
    for t in range(1, T):
        # W_hh @ h on the VPU: H sublane broadcasts of h rows + H FMAs.
        rec = w_cols[0] * h[0:1, :]
        for j in range(1, H):
            rec = rec + w_cols[j] * h[j:j + 1, :]
        h = jnp.tanh(pre[t] + rec)
        out_ref[t] = h               # per-step store, overlaps the recurrence


def exploding_rnn_forward(x, w_ih, w_hh, b_ih, b_hh):
    """Forward pass of ExplodingRNNModel.

    x:    (B, T, 1) float32, batch_first (PyTorch convention)
    w_ih: (H, 1)    torch nn.RNN weight_ih_l0
    w_hh: (H, H)    torch nn.RNN weight_hh_l0
    b_ih: (H,)      torch nn.RNN bias_ih_l0
    b_hh: (H,)      torch nn.RNN bias_hh_l0
    returns: (B, T, H) float32 — `output` of nn.RNN
    """
    B, T, I = x.shape
    H = w_hh.shape[0]
    assert I == 1, "ExplodingRNNModel has input_size=1"

    # Time-major, feature dim squeezed: (T, B).
    xT = jnp.transpose(x[:, :, 0])

    # Pack all parameters into one (H, H+2) array -> a single DMA.
    # (In a real model this would be pre-packed once at parameter-prep time.)
    params = jnp.concatenate(
        [w_hh.astype(jnp.float32),
         w_ih.reshape(H, 1).astype(jnp.float32),
         (b_ih + b_hh).reshape(H, 1).astype(jnp.float32)],
        axis=1)

    out_thb = pl.pallas_call(
        _rnn_kernel,
        out_shape=jax.ShapeDtypeStruct((T, H, B), jnp.float32),
        in_specs=[
            pl.BlockSpec(memory_space=pltpu.MemorySpace.VMEM),  # xT (T, B)
            pl.BlockSpec(memory_space=pltpu.MemorySpace.VMEM),  # params (H, H+2)
        ],
        out_specs=pl.BlockSpec(memory_space=pltpu.MemorySpace.VMEM),
    )(xT.astype(jnp.float32), params)

    # (T, H, B) -> (B, T, H); tiny XLA transpose outside the kernel.
    return jnp.transpose(out_thb, (2, 0, 1))


def _reference_rnn(x, w_ih, w_hh, b_ih, b_hh):
    """Pure-JAX reference (lax.scan) for correctness check."""
    B, T, I = x.shape
    H = w_hh.shape[0]
    h0 = jnp.zeros((B, H), jnp.float32)

    def step(h, x_t):
        h_new = jnp.tanh(x_t @ w_ih.T + b_ih + h @ w_hh.T + b_hh)
        return h_new, h_new

    _, ys = lax.scan(step, h0, jnp.transpose(x, (1, 0, 2)))
    return jnp.transpose(ys, (1, 0, 2))


if __name__ == "__main__":
    key = jax.random.PRNGKey(0)
    k_x, k1, k2, k3, k4 = jax.random.split(key, 5)

    B, T = 2, 8
    I, H = INPUT_SIZE, HIDDEN_SIZE

    # Deterministic parameter init mirroring nn.RNN: U(-1/sqrt(H), 1/sqrt(H))
    bound = 1.0 / jnp.sqrt(jnp.float32(H))
    w_ih = jax.random.uniform(k1, (H, I), jnp.float32, -bound, bound)
    w_hh = jax.random.uniform(k2, (H, H), jnp.float32, -bound, bound)
    b_ih = jax.random.uniform(k3, (H,), jnp.float32, -bound, bound)
    b_hh = jax.random.uniform(k4, (H,), jnp.float32, -bound, bound)

    x = jax.random.normal(k_x, (B, T, I), jnp.float32)

    out = exploding_rnn_forward(x, w_ih, w_hh, b_ih, b_hh)
    out = jax.block_until_ready(out)

    ref = _reference_rnn(x, w_ih, w_hh, b_ih, b_hh)
    assert out.shape == (B, T, H), out.shape
    assert jnp.allclose(out, ref, atol=1e-5, rtol=1e-5), "mismatch vs reference"

    print("KERNEL_OK")
</pallas_src>

<mosaic_0001>
module attributes {stable_mosaic.version = 11 : i64} {
  func.func @_rnn_kernel(%arg0: memref<8x2xf32, #tpu.memory_space<vmem>>, %arg1: memref<5x7xf32, #tpu.memory_space<vmem>>, %arg2: memref<8x5x2xf32, #tpu.memory_space<vmem>>) attributes {dimension_semantics = [], scalar_prefetch = 0 : i64, scratch_operands = 0 : i64, tpu.core_type = #tpu.core_type<tc>} {
    %c0 = arith.constant 0 : index
    %c0_0 = arith.constant 0 : index
    %0 = vector.load %arg1[%c0, %c0_0] : memref<5x7xf32, #tpu.memory_space<vmem>>, vector<5x7xf32>
    %c0_1 = arith.constant 0 : index
    %c0_2 = arith.constant 0 : index
    %1 = vector.load %arg0[%c0_1, %c0_2] : memref<8x2xf32, #tpu.memory_space<vmem>>, vector<8x2xf32>
    %2 = vector.extract_strided_slice %0 {offsets = [0, 0], sizes = [5, 1], strides = [1, 1]} : vector<5x7xf32> to vector<5x1xf32>
    %3 = vector.shape_cast %2 : vector<5x1xf32> to vector<5x1xf32>
    %4 = vector.broadcast %3 : vector<5x1xf32> to vector<5x2xf32>
    %5 = vector.extract_strided_slice %0 {offsets = [0, 1], sizes = [5, 1], strides = [1, 1]} : vector<5x7xf32> to vector<5x1xf32>
    %6 = vector.shape_cast %5 : vector<5x1xf32> to vector<5x1xf32>
    %7 = vector.broadcast %6 : vector<5x1xf32> to vector<5x2xf32>
    %8 = vector.extract_strided_slice %0 {offsets = [0, 2], sizes = [5, 1], strides = [1, 1]} : vector<5x7xf32> to vector<5x1xf32>
    %9 = vector.shape_cast %8 : vector<5x1xf32> to vector<5x1xf32>
    %10 = vector.broadcast %9 : vector<5x1xf32> to vector<5x2xf32>
    %11 = vector.extract_strided_slice %0 {offsets = [0, 3], sizes = [5, 1], strides = [1, 1]} : vector<5x7xf32> to vector<5x1xf32>
    %12 = vector.shape_cast %11 : vector<5x1xf32> to vector<5x1xf32>
    %13 = vector.broadcast %12 : vector<5x1xf32> to vector<5x2xf32>
    %14 = vector.extract_strided_slice %0 {offsets = [0, 4], sizes = [5, 1], strides = [1, 1]} : vector<5x7xf32> to vector<5x1xf32>
    %15 = vector.shape_cast %14 : vector<5x1xf32> to vector<5x1xf32>
    %16 = vector.broadcast %15 : vector<5x1xf32> to vector<5x2xf32>
    %17 = vector.extract_strided_slice %0 {offsets = [0, 5], sizes = [5, 1], strides = [1, 1]} : vector<5x7xf32> to vector<5x1xf32>
    %18 = vector.shape_cast %17 : vector<5x1xf32> to vector<5x1xf32>
    %19 = vector.broadcast %18 : vector<5x1xf32> to vector<5x2xf32>
    %20 = vector.extract_strided_slice %0 {offsets = [0, 6], sizes = [5, 1], strides = [1, 1]} : vector<5x7xf32> to vector<5x1xf32>
    %21 = vector.shape_cast %20 : vector<5x1xf32> to vector<5x1xf32>
    %22 = vector.broadcast %21 : vector<5x1xf32> to vector<5x2xf32>
    %23 = vector.extract_strided_slice %1 {offsets = [0, 0], sizes = [1, 2], strides = [1, 1]} : vector<8x2xf32> to vector<1x2xf32>
    %24 = vector.broadcast %23 : vector<1x2xf32> to vector<5x2xf32>
    %25 = arith.mulf %19, %24 : vector<5x2xf32>
    %26 = arith.addf %25, %22 : vector<5x2xf32>
    %27 = vector.extract_strided_slice %1 {offsets = [1, 0], sizes = [1, 2], strides = [1, 1]} : vector<8x2xf32> to vector<1x2xf32>
    %28 = vector.broadcast %27 : vector<1x2xf32> to vector<5x2xf32>
    %29 = arith.mulf %19, %28 : vector<5x2xf32>
    %30 = arith.addf %29, %22 : vector<5x2xf32>
    %31 = vector.extract_strided_slice %1 {offsets = [2, 0], sizes = [1, 2], strides = [1, 1]} : vector<8x2xf32> to vector<1x2xf32>
    %32 = vector.broadcast %31 : vector<1x2xf32> to vector<5x2xf32>
    %33 = arith.mulf %19, %32 : vector<5x2xf32>
    %34 = arith.addf %33, %22 : vector<5x2xf32>
    %35 = vector.extract_strided_slice %1 {offsets = [3, 0], sizes = [1, 2], strides = [1, 1]} : vector<8x2xf32> to vector<1x2xf32>
    %36 = vector.broadcast %35 : vector<1x2xf32> to vector<5x2xf32>
    %37 = arith.mulf %19, %36 : vector<5x2xf32>
    %38 = arith.addf %37, %22 : vector<5x2xf32>
    %39 = vector.extract_strided_slice %1 {offsets = [4, 0], sizes = [1, 2], strides = [1, 1]} : vector<8x2xf32> to vector<1x2xf32>
    %40 = vector.broadcast %39 : vector<1x2xf32> to vector<5x2xf32>
    %41 = arith.mulf %19, %40 : vector<5x2xf32>
    %42 = arith.addf %41, %22 : vector<5x2xf32>
    %43 = vector.extract_strided_slice %1 {offsets = [5, 0], sizes = [1, 2], strides = [1, 1]} : vector<8x2xf32> to vector<1x2xf32>
    %44 = vector.broadcast %43 : vector<1x2xf32> to vector<5x2xf32>
    %45 = arith.mulf %19, %44 : vector<5x2xf32>
    %46 = arith.addf %45, %22 : vector<5x2xf32>
    %47 = vector.extract_strided_slice %1 {offsets = [6, 0], sizes = [1, 2], strides = [1, 1]} : vector<8x2xf32> to vector<1x2xf32>
    %48 = vector.broadcast %47 : vector<1x2xf32> to vector<5x2xf32>
    %49 = arith.mulf %19, %48 : vector<5x2xf32>
    %50 = arith.addf %49, %22 : vector<5x2xf32>
    %51 = vector.extract_strided_slice %1 {offsets = [7, 0], sizes = [1, 2], strides = [1, 1]} : vector<8x2xf32> to vector<1x2xf32>
    %52 = vector.broadcast %51 : vector<1x2xf32> to vector<5x2xf32>
    %53 = arith.mulf %19, %52 : vector<5x2xf32>
    %54 = arith.addf %53, %22 : vector<5x2xf32>
    %55 = math.tanh %26 : vector<5x2xf32>
    %c0_3 = arith.constant 0 : index
    %c0_4 = arith.constant 0 : index
    %c0_5 = arith.constant 0 : index
    %56 = vector.load %arg2[%c0_3, %c0_4, %c0_5] : memref<8x5x2xf32, #tpu.memory_space<vmem>>, vector<1x5x2xf32>
    %57 = vector.shape_cast %56 : vector<1x5x2xf32> to vector<5x2xf32>
    %58 = vector.shape_cast %55 : vector<5x2xf32> to vector<1x5x2xf32>
    tpu.vector_store %arg2[%c0_3, %c0_4, %c0_5], %58 {strides = array<i32>} : memref<8x5x2xf32, #tpu.memory_space<vmem>>, vector<1x5x2xf32>,
    %59 = vector.extract_strided_slice %55 {offsets = [0, 0], sizes = [1, 2], strides = [1, 1]} : vector<5x2xf32> to vector<1x2xf32>
    %60 = vector.broadcast %59 : vector<1x2xf32> to vector<5x2xf32>
    %61 = arith.mulf %4, %60 : vector<5x2xf32>
    %62 = vector.extract_strided_slice %55 {offsets = [1, 0], sizes = [1, 2], strides = [1, 1]} : vector<5x2xf32> to vector<1x2xf32>
    %63 = vector.broadcast %62 : vector<1x2xf32> to vector<5x2xf32>
    %64 = arith.mulf %7, %63 : vector<5x2xf32>
    %65 = arith.addf %61, %64 : vector<5x2xf32>
    %66 = vector.extract_strided_slice %55 {offsets = [2, 0], sizes = [1, 2], strides = [1, 1]} : vector<5x2xf32> to vector<1x2xf32>
    %67 = vector.broadcast %66 : vector<1x2xf32> to vector<5x2xf32>
    %68 = arith.mulf %10, %67 : vector<5x2xf32>
    %69 = arith.addf %65, %68 : vector<5x2xf32>
    %70 = vector.extract_strided_slice %55 {offsets = [3, 0], sizes = [1, 2], strides = [1, 1]} : vector<5x2xf32> to vector<1x2xf32>
    %71 = vector.broadcast %70 : vector<1x2xf32> to vector<5x2xf32>
    %72 = arith.mulf %13, %71 : vector<5x2xf32>
    %73 = arith.addf %69, %72 : vector<5x2xf32>
    %74 = vector.extract_strided_slice %55 {offsets = [4, 0], sizes = [1, 2], strides = [1, 1]} : vector<5x2xf32> to vector<1x2xf32>
    %75 = vector.broadcast %74 : vector<1x2xf32> to vector<5x2xf32>
    %76 = arith.mulf %16, %75 : vector<5x2xf32>
    %77 = arith.addf %73, %76 : vector<5x2xf32>
    %78 = arith.addf %30, %77 : vector<5x2xf32>
    %79 = math.tanh %78 : vector<5x2xf32>
    %c1 = arith.constant 1 : index
    %c0_6 = arith.constant 0 : index
    %c0_7 = arith.constant 0 : index
    %80 = vector.load %arg2[%c1, %c0_6, %c0_7] : memref<8x5x2xf32, #tpu.memory_space<vmem>>, vector<1x5x2xf32>
    %81 = vector.shape_cast %80 : vector<1x5x2xf32> to vector<5x2xf32>
    %82 = vector.shape_cast %79 : vector<5x2xf32> to vector<1x5x2xf32>
    tpu.vector_store %arg2[%c1, %c0_6, %c0_7], %82 {strides = array<i32>} : memref<8x5x2xf32, #tpu.memory_space<vmem>>, vector<1x5x2xf32>,
    %83 = vector.extract_strided_slice %79 {offsets = [0, 0], sizes = [1, 2], strides = [1, 1]} : vector<5x2xf32> to vector<1x2xf32>
    %84 = vector.broadcast %83 : vector<1x2xf32> to vector<5x2xf32>
    %85 = arith.mulf %4, %84 : vector<5x2xf32>
    %86 = vector.extract_strided_slice %79 {offsets = [1, 0], sizes = [1, 2], strides = [1, 1]} : vector<5x2xf32> to vector<1x2xf32>
    %87 = vector.broadcast %86 : vector<1x2xf32> to vector<5x2xf32>
    %88 = arith.mulf %7, %87 : vector<5x2xf32>
    %89 = arith.addf %85, %88 : vector<5x2xf32>
    %90 = vector.extract_strided_slice %79 {offsets = [2, 0], sizes = [1, 2], strides = [1, 1]} : vector<5x2xf32> to vector<1x2xf32>
    %91 = vector.broadcast %90 : vector<1x2xf32> to vector<5x2xf32>
    %92 = arith.mulf %10, %91 : vector<5x2xf32>
    %93 = arith.addf %89, %92 : vector<5x2xf32>
    %94 = vector.extract_strided_slice %79 {offsets = [3, 0], sizes = [1, 2], strides = [1, 1]} : vector<5x2xf32> to vector<1x2xf32>
    %95 = vector.broadcast %94 : vector<1x2xf32> to vector<5x2xf32>
    %96 = arith.mulf %13, %95 : vector<5x2xf32>
    %97 = arith.addf %93, %96 : vector<5x2xf32>
    %98 = vector.extract_strided_slice %79 {offsets = [4, 0], sizes = [1, 2], strides = [1, 1]} : vector<5x2xf32> to vector<1x2xf32>
    %99 = vector.broadcast %98 : vector<1x2xf32> to vector<5x2xf32>
    %100 = arith.mulf %16, %99 : vector<5x2xf32>
    %101 = arith.addf %97, %100 : vector<5x2xf32>
    %102 = arith.addf %34, %101 : vector<5x2xf32>
    %103 = math.tanh %102 : vector<5x2xf32>
    %c2 = arith.constant 2 : index
    %c0_8 = arith.constant 0 : index
    %c0_9 = arith.constant 0 : index
    %104 = vector.load %arg2[%c2, %c0_8, %c0_9] : memref<8x5x2xf32, #tpu.memory_space<vmem>>, vector<1x5x2xf32>
    %105 = vector.shape_cast %104 : vector<1x5x2xf32> to vector<5x2xf32>
    %106 = vector.shape_cast %103 : vector<5x2xf32> to vector<1x5x2xf32>
    tpu.vector_store %arg2[%c2, %c0_8, %c0_9], %106 {strides = array<i32>} : memref<8x5x2xf32, #tpu.memory_space<vmem>>, vector<1x5x2xf32>,
    %107 = vector.extract_strided_slice %103 {offsets = [0, 0], sizes = [1, 2], strides = [1, 1]} : vector<5x2xf32> to vector<1x2xf32>
    %108 = vector.broadcast %107 : vector<1x2xf32> to vector<5x2xf32>
    %109 = arith.mulf %4, %108 : vector<5x2xf32>
    %110 = vector.extract_strided_slice %103 {offsets = [1, 0], sizes = [1, 2], strides = [1, 1]} : vector<5x2xf32> to vector<1x2xf32>
    %111 = vector.broadcast %110 : vector<1x2xf32> to vector<5x2xf32>
    %112 = arith.mulf %7, %111 : vector<5x2xf32>
    %113 = arith.addf %109, %112 : vector<5x2xf32>
    %114 = vector.extract_strided_slice %103 {offsets = [2, 0], sizes = [1, 2], strides = [1, 1]} : vector<5x2xf32> to vector<1x2xf32>
    %115 = vector.broadcast %114 : vector<1x2xf32> to vector<5x2xf32>
    %116 = arith.mulf %10, %115 : vector<5x2xf32>
    %117 = arith.addf %113, %116 : vector<5x2xf32>
    %118 = vector.extract_strided_slice %103 {offsets = [3, 0], sizes = [1, 2], strides = [1, 1]} : vector<5x2xf32> to vector<1x2xf32>
    %119 = vector.broadcast %118 : vector<1x2xf32> to vector<5x2xf32>
    %120 = arith.mulf %13, %119 : vector<5x2xf32>
    %121 = arith.addf %117, %120 : vector<5x2xf32>
    %122 = vector.extract_strided_slice %103 {offsets = [4, 0], sizes = [1, 2], strides = [1, 1]} : vector<5x2xf32> to vector<1x2xf32>
    %123 = vector.broadcast %122 : vector<1x2xf32> to vector<5x2xf32>
    %124 = arith.mulf %16, %123 : vector<5x2xf32>
    %125 = arith.addf %121, %124 : vector<5x2xf32>
    %126 = arith.addf %38, %125 : vector<5x2xf32>
    %127 = math.tanh %126 : vector<5x2xf32>
    %c3 = arith.constant 3 : index
    %c0_10 = arith.constant 0 : index
    %c0_11 = arith.constant 0 : index
    %128 = vector.load %arg2[%c3, %c0_10, %c0_11] : memref<8x5x2xf32, #tpu.memory_space<vmem>>, vector<1x5x2xf32>
    %129 = vector.shape_cast %128 : vector<1x5x2xf32> to vector<5x2xf32>
    %130 = vector.shape_cast %127 : vector<5x2xf32> to vector<1x5x2xf32>
    tpu.vector_store %arg2[%c3, %c0_10, %c0_11], %130 {strides = array<i32>} : memref<8x5x2xf32, #tpu.memory_space<vmem>>, vector<1x5x2xf32>,
    %131 = vector.extract_strided_slice %127 {offsets = [0, 0], sizes = [1, 2], strides = [1, 1]} : vector<5x2xf32> to vector<1x2xf32>
    %132 = vector.broadcast %131 : vector<1x2xf32> to vector<5x2xf32>
    %133 = arith.mulf %4, %132 : vector<5x2xf32>
    %134 = vector.extract_strided_slice %127 {offsets = [1, 0], sizes = [1, 2], strides = [1, 1]} : vector<5x2xf32> to vector<1x2xf32>
    %135 = vector.broadcast %134 : vector<1x2xf32> to vector<5x2xf32>
    %136 = arith.mulf %7, %135 : vector<5x2xf32>
    %137 = arith.addf %133, %136 : vector<5x2xf32>
    %138 = vector.extract_strided_slice %127 {offsets = [2, 0], sizes = [1, 2], strides = [1, 1]} : vector<5x2xf32> to vector<1x2xf32>
    %139 = vector.broadcast %138 : vector<1x2xf32> to vector<5x2xf32>
    %140 = arith.mulf %10, %139 : vector<5x2xf32>
    %141 = arith.addf %137, %140 : vector<5x2xf32>
    %142 = vector.extract_strided_slice %127 {offsets = [3, 0], sizes = [1, 2], strides = [1, 1]} : vector<5x2xf32> to vector<1x2xf32>
    %143 = vector.broadcast %142 : vector<1x2xf32> to vector<5x2xf32>
    %144 = arith.mulf %13, %143 : vector<5x2xf32>
    %145 = arith.addf %141, %144 : vector<5x2xf32>
    %146 = vector.extract_strided_slice %127 {offsets = [4, 0], sizes = [1, 2], strides = [1, 1]} : vector<5x2xf32> to vector<1x2xf32>
    %147 = vector.broadcast %146 : vector<1x2xf32> to vector<5x2xf32>
    %148 = arith.mulf %16, %147 : vector<5x2xf32>
    %149 = arith.addf %145, %148 : vector<5x2xf32>
    %150 = arith.addf %42, %149 : vector<5x2xf32>
    %151 = math.tanh %150 : vector<5x2xf32>
    %c4 = arith.constant 4 : index
    %c0_12 = arith.constant 0 : index
    %c0_13 = arith.constant 0 : index
    %152 = vector.load %arg2[%c4, %c0_12, %c0_13] : memref<8x5x2xf32, #tpu.memory_space<vmem>>, vector<1x5x2xf32>
    %153 = vector.shape_cast %152 : vector<1x5x2xf32> to vector<5x2xf32>
    %154 = vector.shape_cast %151 : vector<5x2xf32> to vector<1x5x2xf32>
    tpu.vector_store %arg2[%c4, %c0_12, %c0_13], %154 {strides = array<i32>} : memref<8x5x2xf32, #tpu.memory_space<vmem>>, vector<1x5x2xf32>,
    %155 = vector.extract_strided_slice %151 {offsets = [0, 0], sizes = [1, 2], strides = [1, 1]} : vector<5x2xf32> to vector<1x2xf32>
    %156 = vector.broadcast %155 : vector<1x2xf32> to vector<5x2xf32>
    %157 = arith.mulf %4, %156 : vector<5x2xf32>
    %158 = vector.extract_strided_slice %151 {offsets = [1, 0], sizes = [1, 2], strides = [1, 1]} : vector<5x2xf32> to vector<1x2xf32>
    %159 = vector.broadcast %158 : vector<1x2xf32> to vector<5x2xf32>
    %160 = arith.mulf %7, %159 : vector<5x2xf32>
    %161 = arith.addf %157, %160 : vector<5x2xf32>
    %162 = vector.extract_strided_slice %151 {offsets = [2, 0], sizes = [1, 2], strides = [1, 1]} : vector<5x2xf32> to vector<1x2xf32>
    %163 = vector.broadcast %162 : vector<1x2xf32> to vector<5x2xf32>
    %164 = arith.mulf %10, %163 : vector<5x2xf32>
    %165 = arith.addf %161, %164 : vector<5x2xf32>
    %166 = vector.extract_strided_slice %151 {offsets = [3, 0], sizes = [1, 2], strides = [1, 1]} : vector<5x2xf32> to vector<1x2xf32>
    %167 = vector.broadcast %166 : vector<1x2xf32> to vector<5x2xf32>
    %168 = arith.mulf %13, %167 : vector<5x2xf32>
    %169 = arith.addf %165, %168 : vector<5x2xf32>
    %170 = vector.extract_strided_slice %151 {offsets = [4, 0], sizes = [1, 2], strides = [1, 1]} : vector<5x2xf32> to vector<1x2xf32>
    %171 = vector.broadcast %170 : vector<1x2xf32> to vector<5x2xf32>
    %172 = arith.mulf %16, %171 : vector<5x2xf32>
    %173 = arith.addf %169, %172 : vector<5x2xf32>
    %174 = arith.addf %46, %173 : vector<5x2xf32>
    %175 = math.tanh %174 : vector<5x2xf32>
    %c5 = arith.constant 5 : index
    %c0_14 = arith.constant 0 : index
    %c0_15 = arith.constant 0 : index
    %176 = vector.load %arg2[%c5, %c0_14, %c0_15] : memref<8x5x2xf32, #tpu.memory_space<vmem>>, vector<1x5x2xf32>
    %177 = vector.shape_cast %176 : vector<1x5x2xf32> to vector<5x2xf32>
    %178 = vector.shape_cast %175 : vector<5x2xf32> to vector<1x5x2xf32>
    tpu.vector_store %arg2[%c5, %c0_14, %c0_15], %178 {strides = array<i32>} : memref<8x5x2xf32, #tpu.memory_space<vmem>>, vector<1x5x2xf32>,
    %179 = vector.extract_strided_slice %175 {offsets = [0, 0], sizes = [1, 2], strides = [1, 1]} : vector<5x2xf32> to vector<1x2xf32>
    %180 = vector.broadcast %179 : vector<1x2xf32> to vector<5x2xf32>
    %181 = arith.mulf %4, %180 : vector<5x2xf32>
    %182 = vector.extract_strided_slice %175 {offsets = [1, 0], sizes = [1, 2], strides = [1, 1]} : vector<5x2xf32> to vector<1x2xf32>
    %183 = vector.broadcast %182 : vector<1x2xf32> to vector<5x2xf32>
    %184 = arith.mulf %7, %183 : vector<5x2xf32>
    %185 = arith.addf %181, %184 : vector<5x2xf32>
    %186 = vector.extract_strided_slice %175 {offsets = [2, 0], sizes = [1, 2], strides = [1, 1]} : vector<5x2xf32> to vector<1x2xf32>
    %187 = vector.broadcast %186 : vector<1x2xf32> to vector<5x2xf32>
    %188 = arith.mulf %10, %187 : vector<5x2xf32>
    %189 = arith.addf %185, %188 : vector<5x2xf32>
    %190 = vector.extract_strided_slice %175 {offsets = [3, 0], sizes = [1, 2], strides = [1, 1]} : vector<5x2xf32> to vector<1x2xf32>
    %191 = vector.broadcast %190 : vector<1x2xf32> to vector<5x2xf32>
    %192 = arith.mulf %13, %191 : vector<5x2xf32>
    %193 = arith.addf %189, %192 : vector<5x2xf32>
    %194 = vector.extract_strided_slice %175 {offsets = [4, 0], sizes = [1, 2], strides = [1, 1]} : vector<5x2xf32> to vector<1x2xf32>
    %195 = vector.broadcast %194 : vector<1x2xf32> to vector<5x2xf32>
    %196 = arith.mulf %16, %195 : vector<5x2xf32>
    %197 = arith.addf %193, %196 : vector<5x2xf32>
    %198 = arith.addf %50, %197 : vector<5x2xf32>
    %199 = math.tanh %198 : vector<5x2xf32>
    %c6 = arith.constant 6 : index
    %c0_16 = arith.constant 0 : index
    %c0_17 = arith.constant 0 : index
    %200 = vector.load %arg2[%c6, %c0_16, %c0_17] : memref<8x5x2xf32, #tpu.memory_space<vmem>>, vector<1x5x2xf32>
    %201 = vector.shape_cast %200 : vector<1x5x2xf32> to vector<5x2xf32>
    %202 = vector.shape_cast %199 : vector<5x2xf32> to vector<1x5x2xf32>
    tpu.vector_store %arg2[%c6, %c0_16, %c0_17], %202 {strides = array<i32>} : memref<8x5x2xf32, #tpu.memory_space<vmem>>, vector<1x5x2xf32>,
    %203 = vector.extract_strided_slice %199 {offsets = [0, 0], sizes = [1, 2], strides = [1, 1]} : vector<5x2xf32> to vector<1x2xf32>
    %204 = vector.broadcast %203 : vector<1x2xf32> to vector<5x2xf32>
    %205 = arith.mulf %4, %204 : vector<5x2xf32>
    %206 = vector.extract_strided_slice %199 {offsets = [1, 0], sizes = [1, 2], strides = [1, 1]} : vector<5x2xf32> to vector<1x2xf32>
    %207 = vector.broadcast %206 : vector<1x2xf32> to vector<5x2xf32>
    %208 = arith.mulf %7, %207 : vector<5x2xf32>
    %209 = arith.addf %205, %208 : vector<5x2xf32>
    %210 = vector.extract_strided_slice %199 {offsets = [2, 0], sizes = [1, 2], strides = [1, 1]} : vector<5x2xf32> to vector<1x2xf32>
    %211 = vector.broadcast %210 : vector<1x2xf32> to vector<5x2xf32>
    %212 = arith.mulf %10, %211 : vector<5x2xf32>
    %213 = arith.addf %209, %212 : vector<5x2xf32>
    %214 = vector.extract_strided_slice %199 {offsets = [3, 0], sizes = [1, 2], strides = [1, 1]} : vector<5x2xf32> to vector<1x2xf32>
    %215 = vector.broadcast %214 : vector<1x2xf32> to vector<5x2xf32>
    %216 = arith.mulf %13, %215 : vector<5x2xf32>
    %217 = arith.addf %213, %216 : vector<5x2xf32>
    %218 = vector.extract_strided_slice %199 {offsets = [4, 0], sizes = [1, 2], strides = [1, 1]} : vector<5x2xf32> to vector<1x2xf32>
    %219 = vector.broadcast %218 : vector<1x2xf32> to vector<5x2xf32>
    %220 = arith.mulf %16, %219 : vector<5x2xf32>
    %221 = arith.addf %217, %220 : vector<5x2xf32>
    %222 = arith.addf %54, %221 : vector<5x2xf32>
    %223 = math.tanh %222 : vector<5x2xf32>
    %c7 = arith.constant 7 : index
    %c0_18 = arith.constant 0 : index
    %c0_19 = arith.constant 0 : index
    %224 = vector.load %arg2[%c7, %c0_18, %c0_19] : memref<8x5x2xf32, #tpu.memory_space<vmem>>, vector<1x5x2xf32>
    %225 = vector.shape_cast %224 : vector<1x5x2xf32> to vector<5x2xf32>
    %226 = vector.shape_cast %223 : vector<5x2xf32> to vector<1x5x2xf32>
    tpu.vector_store %arg2[%c7, %c0_18, %c0_19], %226 {strides = array<i32>} : memref<8x5x2xf32, #tpu.memory_space<vmem>>, vector<1x5x2xf32>,
    return
  }
}

</mosaic_0001>

<bundles_post_ra>
// kernel: tpu_custom_call.1
= control target key start
LH: loop header
LB: loop body
LE: loop exit
PB: predicated region body
PF: predicated region fallthrough
CT: control target
= control target key end

     0   :  { %v366_v0 = vmov 5   ;;  %v367_v2 = vmov 0   ;;  %v42_v3 = vlaneseq  ;;  %v368_v6 = vmov 6   ;;  %s546_s1 = inlined_call_operand.vmem [shape: f32[5,7], index: 1, kind: input, shape index: {}]   ;;  %s547_s0 = inlined_call_operand.vmem [shape: f32[8,2], index: 0, kind: input, shape index: {}]   ;;  %s548_s2 = inlined_call_operand.vmem [shape: f32[8,5,2], index: 2, kind: output, shape index: {}]  }
   0x1   :  { %342 = vset.pattern.permute.xlu0 %v366_v0  ;;  %v11_v1 = vld [vmem:[%s546_s1] sm:$0x1f]  ;;  %344 = vset.pattern.permute.xlu1 %v367_v2  ;;  %v369_v7 = vmov 1   ;;  %v370_v14 = vmov 2   ;;  %v371_v15 = vmov 3   ;;  %v372_v16 = vmov 4  }
   0x2   :  { %35 = vperm.xlu0 %342, %v11_v1   ;;  %15 = vperm.xlu1 %344, %v11_v1   ;;  %v43_v4 = vshrl.u32 %v42_v3, 7  ;;  %v394_v5 = vld [vmem:[%s547_s0] sm:$0xff]  ;;  %vm91_vm0 = vcmask 12288  }
   0x4   :  { %v74_v8 = vsub.s32 5, %v43_v4  ;;  %v80_v9 = vsub.s32 6, %v43_v4  ;;  %v86_v10 = vsub.s32 7, %v43_v4  ;;  %v399_v17 = vsub.s32 3, %v43_v4 }
   0x5   :  { %v401_v18 = vsub.s32 4, %v43_v4  ;;  %v403_v19 = vsub.s32 0, %v43_v4  ;;  %v425_v39 = vsub.s32 1, %v43_v4  ;;  %v427_v40 = vsub.s32 2, %v43_v4 }
   0x6   :  { %343 = vset.pattern.permute.xlu0 %v368_v6  ;;  %345 = vset.pattern.permute.xlu1 %v369_v7  ;;  %v75_v11 = vrot.slane %v394_v5, %v74_v8  ;;  %v81_v12 = vrot.slane %v394_v5, %v80_v9  ;;  %v87_v13 = vrot.slane %v394_v5, %v86_v10 }
   0x7   :  { %39 = vperm.xlu0 %343, %v11_v1   ;;  %19 = vperm.xlu1 %345, %v11_v1   ;;  %v63_v20 = vrot.slane %v394_v5, %v399_v17  ;;  %v69_v21 = vrot.slane %v394_v5, %v401_v18  ;;  %v45_v23 = vrot.slane %v394_v5, %v403_v19 }
   0x8   :  { %v51_v50 = vrot.slane %v394_v5, %v425_v39  ;;  %v57_v7 = vrot.slane %v394_v5, %v427_v40 }
   0xb   :  { %346 = vset.pattern.permute.xlu1 %v370_v14  ;;  %347 = vset.pattern.permute.xlu0 %v371_v15 }
   0xc   :  { %23 = vperm.xlu1 %346, %v11_v1   ;;  %27 = vperm.xlu0 %347, %v11_v1  }
  0x10   :  { %348 = vset.pattern.permute.xlu1 %v372_v16  ;;  %349 = vset.pattern.permute.xlu0 %v368_v6 }
  0x11   :  { %31 = vperm.xlu1 %348, %v11_v1  }
  0x81   :  { %v36_v22 = vpop.permute.xlu0 %35  ;;  %v411_v32 = vpop.permute.xlu1 %15 }
  0x82   :  { %v64_v24 = vmul.f32 %v63_v20, %v36_v22  ;;  %v70_v25 = vmul.f32 %v69_v21, %v36_v22  ;;  %v76_v26 = vmul.f32 %v75_v11, %v36_v22  ;;  %v82_v27 = vmul.f32 %v81_v12, %v36_v22 }
  0x83   :  { %v88_v28 = vmul.f32 %v87_v13, %v36_v22  ;;  %v46_v29 = vmul.f32 %v45_v23, %v36_v22  ;;  %v52_v57 = vmul.f32 %v51_v50, %v36_v22  ;;  %v58_v13 = vmul.f32 %v57_v7, %v36_v22 }
  0x86   :  { %v40_v30 = vpop.permute.xlu0 %39  ;;  %v423_v38 = vpop.permute.xlu1 %19 }
  0x87   :  { %v47_v31 = vadd.f32 %v46_v29, %v40_v30  ;;  %v413_v33 = vadd.f32 %v64_v24, %v40_v30  ;;  %v415_v34 = vadd.f32 %v70_v25, %v40_v30  ;;  %v417_v35 = vadd.f32 %v76_v26, %v40_v30 }
  0x88   :  { %v419_v36 = vadd.f32 %v82_v27, %v40_v30  ;;  %v421_v37 = vadd.f32 %v88_v28, %v40_v30  ;;  %v53_v60 = vadd.f32 %v52_v57, %v40_v30  ;;  %v59_v16 = vadd.f32 %v58_v13, %v40_v30 }
  0x89   :  { %350 = vtanh.f32 %v47_v31 }
  0x8b   :  { %v429_v42 = vpop.permute.xlu1 %23  ;;  %v441_v49 = vpop.permute.xlu0 %27 }
  0x90   :  { %v447_v54 = vpop.permute.xlu1 %31 }
  0x93   :  { %v351_v41 = vpop.eup %350 }
  0x94   :  { %v96_v43 = vrot.slane %v351_v41, %v403_v19  ;;  %v101_v44 = vrot.slane %v351_v41, %v425_v39  ;;  %v107_v45 = vrot.slane %v351_v41, %v427_v40  ;;  %92 = vst.msk [vmem:[%s548_s2] sm:$0x1f] %vm91_vm0, %v351_v41  ;;  %v113_v48 = vrot.slane %v351_v41, %v399_v17 }
  0x95   :  { %v119_v53 = vrot.slane %v351_v41, %v401_v18 }
  0x96   :  { %v97_v46 = vmul.f32 %v96_v43, %v411_v32  ;;  %v102_v47 = vmul.f32 %v101_v44, %v423_v38  ;;  %v108_v52 = vmul.f32 %v107_v45, %v429_v42  ;;  %v114_v56 = vmul.f32 %v113_v48, %v441_v49 }
  0x97   :  { %v120_v58 = vmul.f32 %v119_v53, %v447_v54 }
  0x98   :  { %v103_v51 = vadd.f32 %v102_v47, %v97_v46 }
  0x9a   :  { %v109_v55 = vadd.f32 %v108_v52, %v103_v51 }
  0x9c   :  { %v115_v59 = vadd.f32 %v114_v56, %v109_v55 }
  0x9e   :  { %v121_v61 = vadd.f32 %v120_v58, %v115_v59 }
  0xa0   :  { %v122_v62 = vadd.f32 %v121_v61, %v53_v60 }
  0xa2   :  { %352 = vtanh.f32 %v122_v62 }
  0xac   :  { %v353_v63 = vpop.eup %352 }
  0xad   :  { %328 = vst.msk [vmem:[%s548_s2 + $0x8] sm:$0x1f] %vm91_vm0, %v353_v63  ;;  %v129_v0 = vrot.slane %v353_v63, %v403_v19  ;;  %v134_v1 = vrot.slane %v353_v63, %v425_v39  ;;  %v140_v2 = vrot.slane %v353_v63, %v427_v40  ;;  %v146_v6 = vrot.slane %v353_v63, %v399_v17 }
  0xae   :  { %v152_v10 = vrot.slane %v353_v63, %v401_v18 }
  0xaf   :  { %v130_v3 = vmul.f32 %v129_v0, %v411_v32  ;;  %v135_v4 = vmul.f32 %v134_v1, %v423_v38  ;;  %v141_v9 = vmul.f32 %v140_v2, %v429_v42  ;;  %v147_v12 = vmul.f32 %v146_v6, %v441_v49 }
  0xb0   :  { %v153_v15 = vmul.f32 %v152_v10, %v447_v54 }
  0xb1   :  { %v136_v8 = vadd.f32 %v135_v4, %v130_v3 }
  0xb3   :  { %v142_v11 = vadd.f32 %v141_v9, %v136_v8 }
  0xb5   :  { %v148_v14 = vadd.f32 %v147_v12, %v142_v11 }
  0xb7   :  { %v154_v20 = vadd.f32 %v153_v15, %v148_v14 }
  0xb9   :  { %v155_v21 = vadd.f32 %v154_v20, %v59_v16 }
  0xbb   :  { %354 = vtanh.f32 %v155_v21 }
  0xc5   :  { %v355_v23 = vpop.eup %354 }
  0xc6   :  { %329 = vst.msk [vmem:[%s548_s2 + $0x10] sm:$0x1f] %vm91_vm0, %v355_v23  ;;  %v162_v5 = vrot.slane %v355_v23, %v403_v19  ;;  %v167_v24 = vrot.slane %v355_v23, %v425_v39  ;;  %v173_v25 = vrot.slane %v355_v23, %v427_v40  ;;  %v179_v27 = vrot.slane %v355_v23, %v399_v17 }
  0xc7   :  { %v185_v30 = vrot.slane %v355_v23, %v401_v18 }
  0xc8   :  { %v163_v22 = vmul.f32 %v162_v5, %v411_v32  ;;  %v168_v26 = vmul.f32 %v167_v24, %v423_v38  ;;  %v174_v29 = vmul.f32 %v173_v25, %v429_v42  ;;  %v180_v41 = vmul.f32 %v179_v27, %v441_v49 }
  0xc9   :  { %v186_v44 = vmul.f32 %v185_v30, %v447_v54 }
  0xca   :  { %v169_v28 = vadd.f32 %v168_v26, %v163_v22 }
  0xcc   :  { %v175_v31 = vadd.f32 %v174_v29, %v169_v28 }
  0xce   :  { %v181_v43 = vadd.f32 %v180_v41, %v175_v31 }
  0xd0   :  { %v187_v45 = vadd.f32 %v186_v44, %v181_v43 }
  0xd2   :  { %v188_v46 = vadd.f32 %v187_v45, %v413_v33 }
  0xd4   :  { %356 = vtanh.f32 %v188_v46 }
  0xde   :  { %v357_v47 = vpop.eup %356 }
  0xdf   :  { %330 = vst.msk [vmem:[%s548_s2 + $0x18] sm:$0x1f] %vm91_vm0, %v357_v47  ;;  %v195_v48 = vrot.slane %v357_v47, %v403_v19  ;;  %v200_v50 = vrot.slane %v357_v47, %v425_v39  ;;  %v206_v51 = vrot.slane %v357_v47, %v427_v40  ;;  %v212_v55 = vrot.slane %v357_v47, %v399_v17 }
  0xe0   :  { %v218_v57 = vrot.slane %v357_v47, %v401_v18 }
  0xe1   :  { %v196_v52 = vmul.f32 %v195_v48, %v411_v32  ;;  %v201_v53 = vmul.f32 %v200_v50, %v423_v38  ;;  %v207_v56 = vmul.f32 %v206_v51, %v429_v42  ;;  %v213_v59 = vmul.f32 %v212_v55, %v441_v49 }
  0xe2   :  { %v219_v61 = vmul.f32 %v218_v57, %v447_v54 }
  0xe3   :  { %v202_v33 = vadd.f32 %v201_v53, %v196_v52 }
  0xe5   :  { %v208_v58 = vadd.f32 %v207_v56, %v202_v33 }
  0xe7   :  { %v214_v60 = vadd.f32 %v213_v59, %v208_v58 }
  0xe9   :  { %v220_v62 = vadd.f32 %v219_v61, %v214_v60 }
  0xeb   :  { %v221_v63 = vadd.f32 %v220_v62, %v415_v34 }
  0xed   :  { %358 = vtanh.f32 %v221_v63 }
  0xf7   :  { %v359_v0 = vpop.eup %358 }
  0xf8   :  { %331 = vst.msk [vmem:[%s548_s2 + $0x20] sm:$0x1f] %vm91_vm0, %v359_v0  ;;  %v228_v1 = vrot.slane %v359_v0, %v403_v19  ;;  %v233_v2 = vrot.slane %v359_v0, %v425_v39  ;;  %v239_v3 = vrot.slane %v359_v0, %v427_v40  ;;  %v245_v7 = vrot.slane %v359_v0, %v399_v17 }
  0xf9   :  { %v251_v9 = vrot.slane %v359_v0, %v401_v18 }
  0xfa   :  { %v229_v4 = vmul.f32 %v228_v1, %v411_v32  ;;  %v234_v6 = vmul.f32 %v233_v2, %v423_v38  ;;  %v240_v8 = vmul.f32 %v239_v3, %v429_v42  ;;  %v246_v11 = vmul.f32 %v245_v7, %v441_v49 }
  0xfb   :  { %v252_v13 = vmul.f32 %v251_v9, %v447_v54 }
  0xfc   :  { %v235_v34 = vadd.f32 %v234_v6, %v229_v4 }
  0xfe   :  { %v241_v10 = vadd.f32 %v240_v8, %v235_v34 }
 0x100   :  { %v247_v12 = vadd.f32 %v246_v11, %v241_v10 }
 0x102   :  { %v253_v14 = vadd.f32 %v252_v13, %v247_v12 }
 0x104   :  { %v254_v15 = vadd.f32 %v253_v14, %v417_v35 }
 0x106   :  { %360 = vtanh.f32 %v254_v15 }
 0x110   :  { %v361_v16 = vpop.eup %360 }
 0x111   :  { %332 = vst.msk [vmem:[%s548_s2 + $0x28] sm:$0x1f] %vm91_vm0, %v361_v16  ;;  %v261_v20 = vrot.slane %v361_v16, %v403_v19  ;;  %v266_v21 = vrot.slane %v361_v16, %v425_v39  ;;  %v272_v23 = vrot.slane %v361_v16, %v427_v40  ;;  %v278_v25 = vrot.slane %v361_v16, %v399_v17 }
 0x112   :  { %v284_v26 = vrot.slane %v361_v16, %v401_v18 }
 0x113   :  { %v262_v5 = vmul.f32 %v261_v20, %v411_v32  ;;  %v267_v24 = vmul.f32 %v266_v21, %v423_v38  ;;  %v273_v22 = vmul.f32 %v272_v23, %v429_v42  ;;  %v279_v28 = vmul.f32 %v278_v25, %v441_v49 }
 0x114   :  { %v285_v30 = vmul.f32 %v284_v26, %v447_v54 }
 0x115   :  { %v268_v35 = vadd.f32 %v267_v24, %v262_v5 }
 0x117   :  { %v274_v27 = vadd.f32 %v273_v22, %v268_v35 }
 0x119   :  { %v280_v29 = vadd.f32 %v279_v28, %v274_v27 }
 0x11b   :  { %v286_v31 = vadd.f32 %v285_v30, %v280_v29 }
 0x11d   :  { %v287_v41 = vadd.f32 %v286_v31, %v419_v36 }
 0x11f   :  { %362 = vtanh.f32 %v287_v41 }
 0x129   :  { %v363_v43 = vpop.eup %362 }
 0x12a   :  { %333 = vst.msk [vmem:[%s548_s2 + $0x30] sm:$0x1f] %vm91_vm0, %v363_v43  ;;  %v294_v44 = vrot.slane %v363_v43, %v403_v19  ;;  %v299_v45 = vrot.slane %v363_v43, %v425_v39  ;;  %v305_v46 = vrot.slane %v363_v43, %v427_v40  ;;  %v311_v50 = vrot.slane %v363_v43, %v399_v17 }
 0x12b   :  { %v317_v52 = vrot.slane %v363_v43, %v401_v18 }
 0x12c   :  { %v295_v47 = vmul.f32 %v294_v44, %v411_v32  ;;  %v300_v48 = vmul.f32 %v299_v45, %v423_v38  ;;  %v306_v51 = vmul.f32 %v305_v46, %v429_v42  ;;  %v312_v55 = vmul.f32 %v311_v50, %v441_v49 }
 0x12d   :  { %v318_v19 = vmul.f32 %v317_v52, %v447_v54 }
 0x12e   :  { %v301_v36 = vadd.f32 %v300_v48, %v295_v47 }
 0x130   :  { %v307_v53 = vadd.f32 %v306_v51, %v301_v36 }
 0x132   :  { %v313_v33 = vadd.f32 %v312_v55, %v307_v53 }
 0x134   :  { %v319_v39 = vadd.f32 %v318_v19, %v313_v33 }
 0x136   :  { %v320_v40 = vadd.f32 %v319_v39, %v421_v37 }
 0x138   :  { %364 = vtanh.f32 %v320_v40 }
 0x142   :  { %v365_v32 = vpop.eup %364 }
 0x143   :  { %334 = vst.msk [vmem:[%s548_s2 + $0x38] sm:$0x1f] %vm91_vm0, %v365_v32 }

</bundles_post_ra>
